<compile_context>
chip_gen: v5e
topology: v5e:2x2
jax: 0.10.0
libtpu: 0.0.40
codegen_flags: <defaults>
</compile_context>

<pallas_src>
import functools

import numpy as np
import jax
import jax.numpy as jnp
from jax.experimental import pallas as pl
from jax.experimental.pallas import tpu as pltpu

SIZES = (1, 2, 3, 6)
KU = sum(s * s for s in SIZES)  # 50 pooled cells across all pyramid stages


# ----------------------------------------------------------------------------
# Pallas kernel: fused  ReLU(x @ W_x + U @ P + bias)
# ----------------------------------------------------------------------------
def _bottleneck_kernel(x_ref, w_ref, u_ref, p_ref, b_ref, o_ref, *, mxu_dtype):
    # Main contraction: (tm, C) @ (C, tn) on the MXU, f32 accumulate.
    acc = jnp.dot(
        x_ref[...].astype(mxu_dtype),
        w_ref[...],
        preferred_element_type=jnp.float32,
    )
    # Fused prior-partial sum: (tm, 50) @ (50, tn).  U is the constant
    # bilinear-upsample matrix block, P the per-image pooled/projected cells.
    acc = acc + jnp.dot(
        u_ref[...].astype(mxu_dtype),
        p_ref[...].astype(mxu_dtype),
        preferred_element_type=jnp.float32,
    )
    acc = acc + b_ref[...]
    o_ref[...] = jnp.maximum(acc, 0.0).astype(o_ref.dtype)


def fused_bottleneck_pallas(x_nmc, w_x, u_all, p_all, bias_row, *,
                            mxu_dtype=jnp.bfloat16, tm=512, tn=512):
    """x_nmc: (N, H*W, C) f32,  w_x: (C, Np) mxu_dtype,  u_all: (H*W, KU) f32,
    p_all: (N, KU, Np) f32,  bias_row: (1, Np) f32.
    Np must be a multiple of 128 (lane-dense output stores)."""
    N, HW, C = x_nmc.shape
    ku = u_all.shape[1]
    Np = w_x.shape[1]
    tm = min(tm, HW)
    tn = min(tn, Np)
    grid = (N, pl.cdiv(HW, tm), pl.cdiv(Np, tn))
    kernel = functools.partial(_bottleneck_kernel, mxu_dtype=mxu_dtype)
    return pl.pallas_call(
        kernel,
        out_shape=jax.ShapeDtypeStruct((N, HW, Np), x_nmc.dtype),
        grid_spec=pltpu.PrefetchScalarGridSpec(
            num_scalar_prefetch=0,
            grid=grid,
            in_specs=[
                pl.BlockSpec((None, tm, C), lambda n, i, j: (n, i, 0)),   # pixels
                pl.BlockSpec((C, tn), lambda n, i, j: (0, j)),            # W_x slab
                pl.BlockSpec((tm, ku), lambda n, i, j: (i, 0)),           # upsample mat
                pl.BlockSpec((None, ku, tn), lambda n, i, j: (n, 0, j)),  # pooled cells
                pl.BlockSpec((1, tn), lambda n, i, j: (0, j)),            # bias row
            ],
            out_specs=pl.BlockSpec((None, tm, tn), lambda n, i, j: (n, i, j)),
        ),
        compiler_params=pltpu.CompilerParams(
            dimension_semantics=("parallel", "parallel", "parallel"),
        ),
    )(x_nmc, w_x, u_all, p_all, bias_row)


# ----------------------------------------------------------------------------
# Glue: pooling / upsampling interpolation matrices (tiny, precomputed)
# ----------------------------------------------------------------------------
def adaptive_pool_matrix(in_size, out_size):
    # Row i averages input[start:end] exactly like AdaptiveAvgPool2d.
    P = np.zeros((out_size, in_size), np.float32)
    for i in range(out_size):
        start = (i * in_size) // out_size
        end = -(-((i + 1) * in_size) // out_size)  # ceil div
        P[i, start:end] = 1.0 / (end - start)
    return jnp.asarray(P)


def bilinear_upsample_matrix(in_size, out_size):
    # F.upsample(mode='bilinear') ==> align_corners=False semantics.
    M = np.zeros((out_size, in_size), np.float32)
    if in_size == 1:
        M[:, 0] = 1.0
        return jnp.asarray(M)
    scale = in_size / out_size
    for o in range(out_size):
        src = (o + 0.5) * scale - 0.5
        src = max(src, 0.0)
        i0 = min(int(np.floor(src)), in_size - 1)
        i1 = min(i0 + 1, in_size - 1)
        frac = src - i0
        M[o, i0] += 1.0 - frac
        M[o, i1] += frac
    return jnp.asarray(M)


def _build_upsample_and_parts(x_nhwc, stage_ws, w_slices, H, W):
    """Returns
      u_all: (H*W, 50) constant separable-bilinear interpolation matrix
      p_all: (N, 50, Np) per-image pooled cells already pushed through the
             stage 1x1 conv and the matching bottleneck weight slice.
    So that  prior_partial_sum[n] == u_all @ p_all[n]  (done inside the kernel)."""
    N = x_nhwc.shape[0]
    u_blocks, p_blocks = [], []
    for size, sw, wsl in zip(SIZES, stage_ws, w_slices):
        Ph = adaptive_pool_matrix(H, size)                        # (s, H)
        Pw = adaptive_pool_matrix(W, size)                        # (s, W)
        pooled = jnp.einsum("sh,nhwc,tw->nstc", Ph, x_nhwc, Pw)   # (N,s,s,C)
        part = pooled.reshape(N, size * size, -1) @ sw @ wsl      # (N,s*s,Np)
        p_blocks.append(part)
        Uh = bilinear_upsample_matrix(size, H)                    # (H, s)
        Uw = bilinear_upsample_matrix(size, W)                    # (W, s)
        u = jnp.einsum("hs,wt->hwst", Uh, Uw).reshape(H * W, size * size)
        u_blocks.append(u)
    u_all = jnp.concatenate(u_blocks, axis=1)                     # (H*W, 50)
    p_all = jnp.concatenate(p_blocks, axis=1)                     # (N, 50, Np)
    return u_all, p_all


# ----------------------------------------------------------------------------
# PSPModule forward
# ----------------------------------------------------------------------------
def init_params(key, features, out_features):
    keys = jax.random.split(key, len(SIZES) + 2)
    params = {"stage_w": [], "bottle_w": None, "bottle_b": None}
    for i, _ in enumerate(SIZES):
        # PyTorch conv weight (Cout, Cin, 1, 1); stored as (Cin, Cout) matrix.
        w = jax.random.normal(keys[i], (features, features), jnp.float32) * 0.1
        params["stage_w"].append(w)
    k_in = features * (len(SIZES) + 1)
    params["bottle_w"] = (
        jax.random.normal(keys[-2], (k_in, out_features), jnp.float32) * 0.1
    )
    params["bottle_b"] = (
        jax.random.normal(keys[-1], (out_features,), jnp.float32) * 0.1
    )
    return params


def psp_forward_nhwc(x_nhwc, params, *, mxu_dtype=jnp.bfloat16, tm=512, tn=512):
    N, H, W, C = x_nhwc.shape
    bw = params["bottle_w"]            # (5C, Nout)
    bb = params["bottle_b"]            # (Nout,)
    Nout = bw.shape[1]

    # Pad Nout to a multiple of 128 so the Pallas output stores are lane-dense
    # (unmasked vst).  Padding is on the weights/bias only; sliced off after.
    Np = ((Nout + 127) // 128) * 128
    pad = Np - Nout
    if pad:
        bw = jnp.pad(bw, ((0, 0), (0, pad)))
        bb = jnp.pad(bb, (0, pad))

    n_stages = len(SIZES)
    w_slices = [bw[i * C:(i + 1) * C] for i in range(n_stages)]   # (C, Np) each
    w_x = bw[n_stages * C:]                                       # (C, Np)

    u_all, p_all = _build_upsample_and_parts(
        x_nhwc, params["stage_w"], w_slices, H, W)

    out_flat = fused_bottleneck_pallas(
        x_nhwc.reshape(N, H * W, C),
        w_x.astype(mxu_dtype),          # stream main weight at MXU precision
        u_all,
        p_all,
        bb.reshape(1, Np),
        mxu_dtype=mxu_dtype, tm=tm, tn=tn,
    )
    if pad:
        out_flat = out_flat[..., :Nout]
    return out_flat.reshape(N, H, W, Nout)


def psp_forward(x_nchw, params, *, mxu_dtype=jnp.bfloat16, tm=512, tn=512):
    # TODO(synk): at real model scale keep activations NHWC end-to-end and drop
    # these two boundary transposes (pure HBM glue added only to match NCHW).
    x_nhwc = jnp.transpose(x_nchw, (0, 2, 3, 1))
    out = psp_forward_nhwc(x_nhwc, params, mxu_dtype=mxu_dtype, tm=tm, tn=tn)
    return jnp.transpose(out, (0, 3, 1, 2))


def psp_forward_ref(x_nchw, params):
    # Pure-JAX reference mirroring the PyTorch module (concat path).
    N, C, H, W = x_nchw.shape
    x_nhwc = jnp.transpose(x_nchw, (0, 2, 3, 1))
    priors = []
    for size, w_stage in zip(SIZES, params["stage_w"]):
        Ph = adaptive_pool_matrix(H, size)
        Pw = adaptive_pool_matrix(W, size)
        pooled = jnp.einsum("sh,nchw,tw->nstc", Ph, x_nchw, Pw)
        conv_out = pooled @ w_stage
        Uh = bilinear_upsample_matrix(size, H)
        Uw = bilinear_upsample_matrix(size, W)
        priors.append(jnp.einsum("hs,nstc,wt->nhwc", Uh, conv_out, Uw))
    priors.append(x_nhwc)
    cat = jnp.concatenate(priors, axis=-1)
    out = jnp.maximum(cat @ params["bottle_w"] + params["bottle_b"], 0.0)
    return jnp.transpose(out, (0, 3, 1, 2))


if __name__ == "__main__":
    features = 4
    out_features = 32
    key = jax.random.PRNGKey(0)
    k_x, k_p = jax.random.split(key)

    x = jax.random.normal(k_x, (2, features, 16, 16), jnp.float32)  # NCHW
    params = init_params(k_p, features, out_features)

    ref = jax.block_until_ready(psp_forward_ref(x, params))

    # f32-MXU path: tight match against the reference.
    fwd_f32 = jax.jit(functools.partial(psp_forward, mxu_dtype=jnp.float32))
    out_f32 = jax.block_until_ready(fwd_f32(x, params))
    assert out_f32.shape == (2, out_features, 16, 16), out_f32.shape
    assert np.allclose(np.asarray(out_f32), np.asarray(ref),
                       atol=1e-4, rtol=1e-4)

    # Default bf16-MXU path (production precision): looser tolerance.
    fwd_bf16 = jax.jit(psp_forward)
    out_bf16 = jax.block_until_ready(fwd_bf16(x, params))
    assert out_bf16.shape == (2, out_features, 16, 16), out_bf16.shape
    assert np.allclose(np.asarray(out_bf16), np.asarray(ref),
                       atol=2e-2, rtol=2e-2)

    print("KERNEL_OK")
</pallas_src>

<mosaic_0001>
module attributes {stable_mosaic.version = 11 : i64} {
  func.func @_bottleneck_kernel(%arg0: i32, %arg1: i32, %arg2: i32, %arg3: memref<1x256x4xf32, #tpu.memory_space<vmem>>, %arg4: memref<4x128xf32, #tpu.memory_space<vmem>>, %arg5: memref<256x50xf32, #tpu.memory_space<vmem>>, %arg6: memref<1x50x128xf32, #tpu.memory_space<vmem>>, %arg7: memref<1x128xf32, #tpu.memory_space<vmem>>, %arg8: memref<1x256x128xf32, #tpu.memory_space<vmem>>) attributes {dimension_semantics = [#tpu.dimension_semantics<parallel>, #tpu.dimension_semantics<parallel>, #tpu.dimension_semantics<parallel>], iteration_bounds = array<i64: 2, 1, 1>, scalar_prefetch = 0 : i64, scratch_operands = 0 : i64, tpu.core_type = #tpu.core_type<tc>, window_params = [{transform_indices = @transform_0, window_bounds = array<i64: 1, 256, 4>}, {transform_indices = @transform_1, window_bounds = array<i64: 4, 128>}, {transform_indices = @transform_2, window_bounds = array<i64: 256, 50>}, {transform_indices = @transform_3, window_bounds = array<i64: 1, 50, 128>}, {transform_indices = @transform_4, window_bounds = array<i64: 1, 128>}, {transform_indices = @transform_5, window_bounds = array<i64: 1, 256, 128>}]} {
    %c0 = arith.constant 0 : index
    %c0_0 = arith.constant 0 : index
    %c0_1 = arith.constant 0 : index
    %0 = vector.load %arg3[%c0, %c0_0, %c0_1] : memref<1x256x4xf32, #tpu.memory_space<vmem>>, vector<1x256x4xf32>
    %1 = vector.shape_cast %0 : vector<1x256x4xf32> to vector<256x4xf32>
    %c0_2 = arith.constant 0 : index
    %c0_3 = arith.constant 0 : index
    %2 = vector.load %arg4[%c0_2, %c0_3] : memref<4x128xf32, #tpu.memory_space<vmem>>, vector<4x128xf32>
    %cst = arith.constant dense<0.000000e+00> : vector<256x128xf32>
    %3 = tpu.matmul %1, %2, %cst {dimension_numbers = #tpu.dot_dimension_numbers<[1], [0], [0], [1], [0, 0, 1, 1], [], []>} : vector<256x4xf32>, vector<4x128xf32>, vector<256x128xf32> -> vector<256x128xf32>
    %c0_4 = arith.constant 0 : index
    %c0_5 = arith.constant 0 : index
    %4 = vector.load %arg5[%c0_4, %c0_5] : memref<256x50xf32, #tpu.memory_space<vmem>>, vector<256x50xf32>
    %c0_6 = arith.constant 0 : index
    %c0_7 = arith.constant 0 : index
    %c0_8 = arith.constant 0 : index
    %5 = vector.load %arg6[%c0_6, %c0_7, %c0_8] : memref<1x50x128xf32, #tpu.memory_space<vmem>>, vector<1x50x128xf32>
    %6 = vector.shape_cast %5 : vector<1x50x128xf32> to vector<50x128xf32>
    %cst_9 = arith.constant dense<0.000000e+00> : vector<256x128xf32>
    %7 = tpu.matmul %4, %6, %cst_9 {dimension_numbers = #tpu.dot_dimension_numbers<[1], [0], [0], [1], [0, 0, 1, 1], [], []>} : vector<256x50xf32>, vector<50x128xf32>, vector<256x128xf32> -> vector<256x128xf32>
    %8 = arith.addf %3, %7 : vector<256x128xf32>
    %c0_10 = arith.constant 0 : index
    %c0_11 = arith.constant 0 : index
    %9 = vector.load %arg7[%c0_10, %c0_11] : memref<1x128xf32, #tpu.memory_space<vmem>>, vector<1x128xf32>
    %10 = vector.broadcast %9 : vector<1x128xf32> to vector<256x128xf32>
    %11 = arith.addf %8, %10 : vector<256x128xf32>
    %cst_12 = arith.constant 0.000000e+00 : f32
    %12 = vector.broadcast %cst_12 : f32 to vector<256x128xf32>
    %13 = arith.maximumf %11, %12 : vector<256x128xf32>
    %c0_13 = arith.constant 0 : index
    %c0_14 = arith.constant 0 : index
    %c0_15 = arith.constant 0 : index
    %14 = vector.load %arg8[%c0_13, %c0_14, %c0_15] : memref<1x256x128xf32, #tpu.memory_space<vmem>>, vector<1x256x128xf32>
    %15 = vector.shape_cast %14 : vector<1x256x128xf32> to vector<256x128xf32>
    %16 = vector.shape_cast %13 : vector<256x128xf32> to vector<1x256x128xf32>
    tpu.vector_store %arg8[%c0_13, %c0_14, %c0_15], %16 {strides = array<i32>} : memref<1x256x128xf32, #tpu.memory_space<vmem>>, vector<1x256x128xf32>,
    return
  }
  func.func @transform_0(%arg0: i32, %arg1: i32, %arg2: i32) -> (i32, i32, i32) {
    %c0_i32 = arith.constant 0 : i32
    %c0_i32_0 = arith.constant 0 : i32
    return %arg0, %arg1, %c0_i32 : i32, i32, i32
  }
  func.func @transform_1(%arg0: i32, %arg1: i32, %arg2: i32) -> (i32, i32) {
    %c0_i32 = arith.constant 0 : i32
    %c0_i32_0 = arith.constant 0 : i32
    return %c0_i32, %arg2 : i32, i32
  }
  func.func @transform_2(%arg0: i32, %arg1: i32, %arg2: i32) -> (i32, i32) {
    %c0_i32 = arith.constant 0 : i32
    %c0_i32_0 = arith.constant 0 : i32
    return %arg1, %c0_i32 : i32, i32
  }
  func.func @transform_3(%arg0: i32, %arg1: i32, %arg2: i32) -> (i32, i32, i32) {
    %c0_i32 = arith.constant 0 : i32
    %c0_i32_0 = arith.constant 0 : i32
    return %arg0, %c0_i32, %arg2 : i32, i32, i32
  }
  func.func @transform_4(%arg0: i32, %arg1: i32, %arg2: i32) -> (i32, i32) {
    %c0_i32 = arith.constant 0 : i32
    %c0_i32_0 = arith.constant 0 : i32
    return %c0_i32, %arg2 : i32, i32
  }
  func.func @transform_5(%arg0: i32, %arg1: i32, %arg2: i32) -> (i32, i32, i32) {
    %c0_i32 = arith.constant 0 : i32
    return %arg0, %arg1, %arg2 : i32, i32, i32
  }
}

</mosaic_0001>

<bundles_post_ra>
// kernel: psp_forward.1
= control target key start
LH: loop header
LB: loop body
LE: loop exit
PB: predicated region body
PF: predicated region fallthrough
CT: control target
= control target key end

     0   :  { %10 = vsyncpa [#allocation3], 0  ;;  %s1749_s0 = inlined_call_operand.vmem [shape: f32[2,256,4], index: 0, kind: input, shape index: {}]   ;;  %s1750_s1 = inlined_call_operand.vmem [shape: f32[4,128], index: 1, kind: input, shape index: {}]   ;;  %s1751_s2 = inlined_call_operand.vmem [shape: f32[256,50], index: 2, kind: input, shape index: {}]   ;;  %s1752_s3 = inlined_call_operand.vmem [shape: f32[2,50,128], index: 3, kind: input, shape index: {}]   ;;  %s1753_s4 = inlined_call_operand.vmem [shape: f32[1,128], index: 4, kind: input, shape index: {}]   ;;  %s1754_s5 = inlined_call_operand.hbm [shape: f32[2,256,128], index: 5, kind: output, shape index: {}]  }
   0x1   :  { %12 = vsyncpa [#allocation3 + $0x1], 0  ;;  %s1373_s18 = smov 0   ;;  %s1375_s19 = smov 0  }
   0x2   :  { %s1377_s20 = smov 0   ;;  %s1379_s21 = smov 0  }
   0x3   :  { %s1381_s22 = smov 0   ;;  %s1383_s23 = smov 0  }
   0x4 LB: > { %s1109_s24 = sadd.s32 4294967295, %s1339_s23   ;;  %s1110_s25 = sadd.s32 4294967294, %s1339_s23   ;;  %s1339_s23 = sphi %s1383_s23, %s18_s23   ;;  %s1335_s22 = sphi %s1381_s22, %s1761_s22   ;;  %s1331_s21 = sphi %s1379_s21, %s1760_s21   ;;  %s1327_s20 = sphi %s1377_s20, %s1759_s20   ;;  %s1323_s19 = sphi %s1375_s19, %s1758_s19   ;;  %s1319_s18 = sphi %s1373_s18, %s1757_s18  }
   0x5   : > { %s37_s26 = sadd.s32 1, %s1335_s22  ;;  %s182_s27 = sadd.s32 1, %s1327_s20 }
   0x6   : > { %p39_p0 = scmp.ge.s32.totalorder %s37_s26, 2  ;;  %p192_p1 = scmp.ne.s32.totalorder %s1327_s20, %s1323_s19 }
   0x7   : > { %p193_p2 = scmp.eq.s32.totalorder %s1109_s24, 1  ;;  %p198_p3 = scmp.ne.s32.totalorder %s1323_s19, %s1319_s18 }
   0x8   : > { %s1763_s26 = smov (%p39_p0, %s37_s26), 0  ;;  %p199_p5 = scmp.eq.s32.totalorder %s1110_s25, 1 }
   0x9   : > { %p1413_p4 = por %p193_p2, %p192_p1  ;;  %s175_s29 = ssub.s32 %s1335_s22, %s1763_s26 }
   0xa   : > { %p1116_p6 = scmp.ge.s32.totalorder %s1339_s23, 1  ;;  %p180_p7 = scmp.eq.s32.totalorder %s175_s29, 0 }
   0xb   : > { %p1420_p8 = por %p199_p5, %p198_p3  ;;  %p263_p9 = scmp.lt.s32.totalorder %s1339_s23, 3 }
   0xc   : > { %s1426_s6 = scalar_select %p180_p7, %s1327_s20, %s182_s27  }
   0xd   : > { %p264_p10 = pnand %p1116_p6, %p263_p9 }
   0xe   : > { %p316_p11 = scmp.lt.s32.totalorder (!%p264_p10), %s1331_s21, 1  ;;  %s1193_s16 = sshll.u32 (!%p264_p10), %s1331_s21, 8 }
   0xf   : > { %267 = sbr.rel (%p264_p10) target bundleno = 301 (0x12d), region = 40  ;;  %s962_s25 = scalar_lea.hbm (!%p264_p10), %s1754_s5, %s1193_s16 }
  0x10   : > { %s965_s29 = sshll.u32 (!%p264_p10), %s962_s25, 4  ;;  %s966_s29 = int_to_ptr.hbm [resolvable:$true] %s965_s29 }
  0x11   : > { %s1275_s7 = sshra.s32 (!%p264_p10), %s966_s29, 4  ;;  %s1276_s7 = int_to_ptr.hbm [resolvable:$true] %s1275_s7 }
  0x12   : > { %s1277_s8 = scalar_lea.hbm (!%p264_p10), %s1276_s7, 256  ;;  %p1282_p1 = scmp.lt.s32.totalorder (!%p264_p10), %s1276_s7, %s1754_s5 }
  0x13   : > { %p1278_p12 = scmp.ne.s32.totalorder (!%p264_p10), %s1276_s7, %s1277_s8 }
  0x14   : > { %v379_v0 = vld [vmem:[%s1750_s1] sm:$0xf]  ;;  %vm730_vm0 = vcmask 1043456   ;;  %s317_s9 = scalar_select %p316_p11, %s1331_s21, 1  ;;  %vm633_vm1 = vcmask 31744   ;;  %vm516_vm2 = vcmask 1041408  }
  0x15   : > { %1154 = vmatpush.msk.msra.mxu1 %vm730_vm0, %v379_v0  ;;  %1201 = vmatpush.msk.msra.mxu3 %vm730_vm0, %v379_v0  ;;  %v380_v12 = vld [vmem:[%s1751_s2] sm:$0xff]  ;;  %vm419_vm3 = vcmask 408576   ;;  %v381_v16 = vld [vmem:[%s1751_s2 + $0x8] sm:$0xff]  ;;  %v382_v20 = vld [vmem:[%s1751_s2 + $0x10] sm:$0xff]  ;;  %p1279_p13 = pnand %p1278_p12, %p1413_p4 }
  0x16   : > { %s1192_s10 = sshll.u32 %s317_s9, 8  ;;  %s1202_s11 = smul.u32 56, %s317_s9  ;;  %v396_v13 = vld [vmem:[%s1751_s2 + $0x80] sm:$0xff]  ;;  %v397_v17 = vld [vmem:[%s1751_s2 + $0x88] sm:$0xff]  ;;  %v398_v21 = vld [vmem:[%s1751_s2 + $0x90] sm:$0xff] }
  0x17   : > { %s1436_s14 = scalar_lea.vmem %s1749_s0, %s1192_s10  ;;  %v383_v24 = vld [vmem:[%s1751_s2 + $0x18] sm:$0xff]  ;;  %v384_v28 = vld [vmem:[%s1751_s2 + $0x20] sm:$0xff]  ;;  %v385_v32 = vld [vmem:[%s1751_s2 + $0x28] sm:$0xff]  ;;  %p1280_p0 = pneg %p1279_p13 }
  0x18   : > { %v347_v1 = vld [vmem:[%s1436_s14] sm:$0xff]  ;;  %s342_s17 = scalar_lea.vmem %s1752_s3, %s1202_s11  ;;  %v364_v5 = vld [vmem:[%s1436_s14 + $0x88] sm:$0xff]  ;;  %v365_v10 = vld [vmem:[%s1436_s14 + $0x90] sm:$0xff]  ;;  %s1281_s11 = scalar_lea.hbm %s1754_s5, 512 }
  0x19   : > { %1155 = vmatmul.msk.f32.vlgmr.msra.gmra.mxu1 %vm633_vm1, %v347_v1  ;;  %v418_v2 = vld [vmem:[%s342_s17 + $0x30] sm:$0x3]  ;;  %v417_v3 = vld [vmem:[%s342_s17 + $0x28] sm:$0xff]  ;;  %v416_v4 = vld [vmem:[%s342_s17 + $0x20] sm:$0xff]  ;;  %1172 = vmatmul.msk.f32.vlgmr.msra.gmra.mxu3 %vm633_vm1, %v364_v5  ;;  %p1283_p2 = scmp.lt.s32.totalorder %s1281_s11, %s1277_s8 }
  0x1a   : > { %1121 = vmatpush.msk.msra.mxu0 %vm516_vm2, %v418_v2  ;;  %1194 = vmatpush.msk.msra.mxu2 %vm516_vm2, %v418_v2  ;;  %v415_v6 = vld [vmem:[%s342_s17 + $0x18] sm:$0xff]  ;;  %v348_v7 = vld [vmem:[%s1436_s14 + $0x8] sm:$0xff]  ;;  %v414_v8 = vld [vmem:[%s342_s17 + $0x10] sm:$0xff] }
  0x1b   : > { %v413_v9 = vld [vmem:[%s342_s17 + $0x8] sm:$0xff]  ;;  %v412_v11 = vld [vmem:[%s342_s17] sm:$0xff]  ;;  %v349_v14 = vld [vmem:[%s1436_s14 + $0x10] sm:$0xff]  ;;  %p1284_p3 = por %p1283_p2, %p1282_p1 }
  0x1c   : > { %530 = vmatpush.msra.mxu0 %v417_v3  ;;  %1195 = vmatpush.msra.mxu2 %v417_v3  ;;  %v366_v15 = vld [vmem:[%s1436_s14 + $0x98] sm:$0xff]  ;;  %v367_v19 = vld [vmem:[%s1436_s14 + $0xa0] sm:$0xff]  ;;  %v368_v23 = vld [vmem:[%s1436_s14 + $0xa8] sm:$0xff] }
  0x1d   : > { %v350_v18 = vld [vmem:[%s1436_s14 + $0x18] sm:$0xff]  ;;  %v351_v22 = vld [vmem:[%s1436_s14 + $0x20] sm:$0xff]  ;;  %v352_v26 = vld [vmem:[%s1436_s14 + $0x28] sm:$0xff]  ;;  %p1285_p5 = pnand %p1284_p3, %p1280_p0 }
  0x1e   : > { %531 = vmatpush.msra.mxu0 %v416_v4  ;;  %1196 = vmatpush.msra.mxu2 %v416_v4  ;;  %v399_v25 = vld [vmem:[%s1751_s2 + $0x98] sm:$0xff]  ;;  %v369_v27 = vld [vmem:[%s1436_s14 + $0xb0] sm:$0xff]  ;;  %v400_v29 = vld [vmem:[%s1751_s2 + $0xa0] sm:$0xff] }
  0x1f   : > { %v353_v30 = vld [vmem:[%s1436_s14 + $0x30] sm:$0xff]  ;;  %v370_v31 = vld [vmem:[%s1436_s14 + $0xb8] sm:$0xff]  ;;  %v401_v33 = vld [vmem:[%s1751_s2 + $0xa8] sm:$0xff] }
  0x20   : > { %532 = vmatpush.msra.mxu0 %v415_v6  ;;  %1197 = vmatpush.msra.mxu2 %v415_v6  ;;  %v354_v34 = vld [vmem:[%s1436_s14 + $0x38] sm:$0xff]  ;;  %v371_v35 = vld [vmem:[%s1436_s14 + $0xc0] sm:$0xff]  ;;  %v386_v36 = vld [vmem:[%s1751_s2 + $0x30] sm:$0xff] }
  0x21   : > { %1156 = vmatmul.msk.f32.gmra.mxu1 %vm633_vm1, %v348_v7  ;;  %1173 = vmatmul.msk.f32.gmra.mxu3 %vm633_vm1, %v365_v10  ;;  %v402_v37 = vld [vmem:[%s1751_s2 + $0xb0] sm:$0xff]  ;;  %v355_v38 = vld [vmem:[%s1436_s14 + $0x40] sm:$0xff]  ;;  %v372_v39 = vld [vmem:[%s1436_s14 + $0xc8] sm:$0xff] }
  0x22   : > { %533 = vmatpush.msra.mxu0 %v414_v8  ;;  %1198 = vmatpush.msra.mxu2 %v414_v8  ;;  %v387_v40 = vld [vmem:[%s1751_s2 + $0x38] sm:$0xff]  ;;  %v356_v42 = vld [vmem:[%s1436_s14 + $0x48] sm:$0xff]  ;;  %v373_v43 = vld [vmem:[%s1436_s14 + $0xd0] sm:$0xff] }
  0x23   : > { %v403_v41 = vld [vmem:[%s1751_s2 + $0xb8] sm:$0xff]  ;;  %v388_v44 = vld [vmem:[%s1751_s2 + $0x40] sm:$0xff]  ;;  %v357_v46 = vld [vmem:[%s1436_s14 + $0x50] sm:$0xff] }
  0x24   : > { %534 = vmatpush.msra.mxu0 %v413_v9  ;;  %1199 = vmatpush.msra.mxu2 %v413_v9  ;;  %v404_v45 = vld [vmem:[%s1751_s2 + $0xc0] sm:$0xff]  ;;  %v374_v47 = vld [vmem:[%s1436_s14 + $0xd8] sm:$0xff]  ;;  %v389_v48 = vld [vmem:[%s1751_s2 + $0x48] sm:$0xff] }
  0x25   : > { %v405_v49 = vld [vmem:[%s1751_s2 + $0xc8] sm:$0xff]  ;;  %v358_v50 = vld [vmem:[%s1436_s14 + $0x58] sm:$0xff]  ;;  %v375_v51 = vld [vmem:[%s1436_s14 + $0xe0] sm:$0xff] }
  0x26   : > { %535 = vmatpush.msra.mxu0 %v412_v11  ;;  %1200 = vmatpush.msra.mxu2 %v412_v11  ;;  %v390_v52 = vld [vmem:[%s1751_s2 + $0x50] sm:$0xff]  ;;  %v359_v54 = vld [vmem:[%s1436_s14 + $0x60] sm:$0xff]  ;;  %v376_v55 = vld [vmem:[%s1436_s14 + $0xe8] sm:$0xff] }
  0x27   : > { %1122 = vmatmul.msk.f32.vlgmr.msra.gmra.mxu0 %vm419_vm3, %v380_v12  ;;  %1138 = vmatmul.msk.f32.vlgmr.msra.gmra.mxu2 %vm419_vm3, %v396_v13  ;;  %v406_v53 = vld [vmem:[%s1751_s2 + $0xd0] sm:$0xff]  ;;  %v391_v56 = vld [vmem:[%s1751_s2 + $0x58] sm:$0xff]  ;;  %v360_v58 = vld [vmem:[%s1436_s14 + $0x68] sm:$0xff] }
  0x28   : > { %v407_v57 = vld [vmem:[%s1751_s2 + $0xd8] sm:$0xff]  ;;  %v377_v59 = vld [vmem:[%s1436_s14 + $0xf0] sm:$0xff]  ;;  %v392_v60 = vld [vmem:[%s1751_s2 + $0x60] sm:$0xff] }
  0x29   : > { %1157 = vmatmul.msk.f32.gmra.mxu1 %vm633_vm1, %v349_v14  ;;  %1174 = vmatmul.msk.f32.gmra.mxu3 %vm633_vm1, %v366_v15  ;;  %v408_v61 = vld [vmem:[%s1751_s2 + $0xe0] sm:$0xff]  ;;  %v361_v62 = vld [vmem:[%s1436_s14 + $0x70] sm:$0xff]  ;;  %v378_v63 = vld [vmem:[%s1436_s14 + $0xf8] sm:$0xff] }
  0x2a   : > { %v393_v0 = vld [vmem:[%s1751_s2 + $0x68] sm:$0xff]  ;;  %v362_v2 = vld [vmem:[%s1436_s14 + $0x78] sm:$0xff]  ;;  %v394_v3 = vld [vmem:[%s1751_s2 + $0x70] sm:$0xff] }
  0x2b   : > { %v409_v1 = vld [vmem:[%s1751_s2 + $0xe8] sm:$0xff]  ;;  %v410_v4 = vld [vmem:[%s1751_s2 + $0xf0] sm:$0xff]  ;;  %v363_v6 = vld [vmem:[%s1436_s14 + $0x80] sm:$0xff]  ;;  %s312_s14 = sand.u32 1, %s1323_s19  }
  0x2c   : > { %v395_v7 = vld [vmem:[%s1751_s2 + $0x78] sm:$0xff]  ;;  %v1637_v11 = vld [vmem:[%s1753_s4] ss:$0 sm:$0xff]  ;;  %s1117_s13 = sshll.u32 %s312_s14, 8  ;;  %s948_s21 = scalar_lea.sflag [#allocation3], %s312_s14 }
  0x2d   : > { %v411_v8 = vld [vmem:[%s1751_s2 + $0xf8] sm:$0xff]  ;;  %s1644_s15 = scalar_lea.vmem [#allocation2], %s1117_s13 }
  0x2e   : > { %s963_s27 = sshll.u32 %s1644_s15, 4  ;;  %s964_s27 = int_to_ptr.vmem [resolvable:$true] %s963_s27 }
  0x2f   : > { %1123 = vmatmul.msk.f32.gmra.mxu0 %vm419_vm3, %v381_v16  ;;  %1139 = vmatmul.msk.f32.gmra.mxu2 %vm419_vm3, %v397_v17 }
  0x31   : > { %1158 = vmatmul.msk.f32.gmra.mxu1 %vm633_vm1, %v350_v18  ;;  %1175 = vmatmul.msk.f32.gmra.mxu3 %vm633_vm1, %v367_v19 }
  0x37   : > { %1124 = vmatmul.msk.f32.gmra.mxu0 %vm419_vm3, %v382_v20  ;;  %1140 = vmatmul.msk.f32.gmra.mxu2 %vm419_vm3, %v398_v21 }
  0x39   : > { %1159 = vmatmul.msk.f32.gmra.mxu1 %vm633_vm1, %v351_v22  ;;  %1176 = vmatmul.msk.f32.gmra.mxu3 %vm633_vm1, %v368_v23 }
  0x3f   : > { %1125 = vmatmul.msk.f32.gmra.mxu0 %vm419_vm3, %v383_v24  ;;  %1141 = vmatmul.msk.f32.gmra.mxu2 %vm419_vm3, %v399_v25 }
  0x41   : > { %1160 = vmatmul.msk.f32.gmra.mxu1 %vm633_vm1, %v352_v26  ;;  %1177 = vmatmul.msk.f32.gmra.mxu3 %vm633_vm1, %v369_v27 }
  0x47   : > { %1126 = vmatmul.msk.f32.gmra.mxu0 %vm419_vm3, %v384_v28  ;;  %1142 = vmatmul.msk.f32.gmra.mxu2 %vm419_vm3, %v400_v29 }
  0x49   : > { %1161 = vmatmul.msk.f32.gmra.mxu1 %vm633_vm1, %v353_v30  ;;  %1178 = vmatmul.msk.f32.gmra.mxu3 %vm633_vm1, %v370_v31 }
  0x4f   : > { %1127 = vmatmul.msk.f32.gmra.mxu0 %vm419_vm3, %v385_v32  ;;  %1143 = vmatmul.msk.f32.gmra.mxu2 %vm419_vm3, %v401_v33 }
  0x51   : > { %1162 = vmatmul.msk.f32.gmra.mxu1 %vm633_vm1, %v354_v34  ;;  %1179 = vmatmul.msk.f32.gmra.mxu3 %vm633_vm1, %v371_v35 }
  0x57   : > { %1128 = vmatmul.msk.f32.gmra.mxu0 %vm419_vm3, %v386_v36  ;;  %1144 = vmatmul.msk.f32.gmra.mxu2 %vm419_vm3, %v402_v37 }
  0x59   : > { %1163 = vmatmul.msk.f32.gmra.mxu1 %vm633_vm1, %v355_v38  ;;  %1180 = vmatmul.msk.f32.gmra.mxu3 %vm633_vm1, %v372_v39 }
  0x5f   : > { %1129 = vmatmul.msk.f32.gmra.mxu0 %vm419_vm3, %v387_v40  ;;  %1145 = vmatmul.msk.f32.gmra.mxu2 %vm419_vm3, %v403_v41 }
  0x61   : > { %1164 = vmatmul.msk.f32.gmra.mxu1 %vm633_vm1, %v356_v42  ;;  %1181 = vmatmul.msk.f32.gmra.mxu3 %vm633_vm1, %v373_v43 }
  0x67   : > { %1130 = vmatmul.msk.f32.gmra.mxu0 %vm419_vm3, %v388_v44  ;;  %1146 = vmatmul.msk.f32.gmra.mxu2 %vm419_vm3, %v404_v45 }
  0x69   : > { %1165 = vmatmul.msk.f32.gmra.mxu1 %vm633_vm1, %v357_v46  ;;  %1182 = vmatmul.msk.f32.gmra.mxu3 %vm633_vm1, %v374_v47 }
  0x6f   : > { %1131 = vmatmul.msk.f32.gmra.mxu0 %vm419_vm3, %v389_v48  ;;  %1147 = vmatmul.msk.f32.gmra.mxu2 %vm419_vm3, %v405_v49 }
  0x71   : > { %1166 = vmatmul.msk.f32.gmra.mxu1 %vm633_vm1, %v358_v50  ;;  %1183 = vmatmul.msk.f32.gmra.mxu3 %vm633_vm1, %v375_v51 }
  0x77   : > { %1132 = vmatmul.msk.f32.gmra.mxu0 %vm419_vm3, %v390_v52  ;;  %1148 = vmatmul.msk.f32.gmra.mxu2 %vm419_vm3, %v406_v53 }
  0x79   : > { %1167 = vmatmul.msk.f32.gmra.mxu1 %vm633_vm1, %v359_v54  ;;  %1184 = vmatmul.msk.f32.gmra.mxu3 %vm633_vm1, %v376_v55 }
  0x7f   : > { %1133 = vmatmul.msk.f32.gmra.mxu0 %vm419_vm3, %v391_v56  ;;  %1149 = vmatmul.msk.f32.gmra.mxu2 %vm419_vm3, %v407_v57 }
  0x81   : > { %1168 = vmatmul.msk.f32.gmra.mxu1 %vm633_vm1, %v360_v58  ;;  %1185 = vmatmul.msk.f32.gmra.mxu3 %vm633_vm1, %v377_v59 }
  0x87   : > { %1134 = vmatmul.msk.f32.gmra.mxu0 %vm419_vm3, %v392_v60  ;;  %1150 = vmatmul.msk.f32.gmra.mxu2 %vm419_vm3, %v408_v61 }
  0x89   : > { %1169 = vmatmul.msk.f32.gmra.mxu1 %vm633_vm1, %v361_v62  ;;  %1186 = vmatmul.msk.f32.gmra.mxu3 %vm633_vm1, %v378_v63 }
  0x8f   : > { %1135 = vmatmul.msk.f32.gmra.mxu0 %vm419_vm3, %v393_v0  ;;  %1151 = vmatmul.msk.f32.gmra.mxu2 %vm419_vm3, %v409_v1 }
  0x91   : > { %1170 = vmatmul.msk.f32.gmra.mxu1 %vm633_vm1, %v362_v2 }
  0x96   : > { %v751_v5 = vpop.f32.mrf.mxu1 }
  0x97   : > { %1136 = vmatmul.msk.f32.gmra.mxu0 %vm419_vm3, %v394_v3  ;;  %1152 = vmatmul.msk.f32.gmra.mxu2 %vm419_vm3, %v410_v4 }
  0x99   : > { %1171 = vmatmul.msk.f32.gmra.mxu1 %vm633_vm1, %v363_v6 }
  0x9c   : > { %v802_v10 = vpop.f32.mrf.mxu3 }
  0x9e   : > { %v754_v9 = vpop.f32.mrf.mxu1 }
  0x9f   : > { %1137 = vmatmul.msk.f32.gmra.mxu0 %vm419_vm3, %v395_v7  ;;  %1153 = vmatmul.msk.f32.gmra.mxu2 %vm419_vm3, %v411_v8 }
  0xa4   : > { %v537_v12 = vpop.f32.mrf.mxu0  ;;  %v805_v16 = vpop.f32.mrf.mxu3 }
  0xa5   : > { %v752_v13 = vadd.f32 %v751_v5, %v537_v12 }
  0xa6   : > { %v757_v14 = vpop.f32.mrf.mxu1 }
  0xa7   : > { %v851_v15 = vadd.f32 %v1637_v11, %v752_v13 }
  0xa9   : > { %v883_v17 = vmax.f32 %v851_v15, 0.0 }
  0xaa   : > { %v1642_v18 = vpop.f32.mrf.mxu2 }
  0xab   : > { %915 = vst [vmem:[%s1644_s15] sm:$0xff] %v883_v17 }
  0xac   : > { %v540_v19 = vpop.f32.mrf.mxu0  ;;  %v808_v23 = vpop.f32.mrf.mxu3 }
  0xad   : > { %v755_v20 = vadd.f32 %v754_v9, %v540_v19 }
  0xae   : > { %v760_v21 = vpop.f32.mrf.mxu1 }
  0xaf   : > { %v852_v22 = vadd.f32 %v1637_v11, %v755_v20 }
  0xb1   : > { %v884_v24 = vmax.f32 %v852_v22, 0.0 }
  0xb2   : > { %v588_v25 = vpop.f32.mrf.mxu2 }
  0xb3   : > { %916 = vst [vmem:[%s1644_s15 + $0x8] sm:$0xff] %v884_v24  ;;  %v803_v26 = vadd.f32 %v802_v10, %v588_v25 }
  0xb4   : > { %v543_v27 = vpop.f32.mrf.mxu0  ;;  %v811_v33 = vpop.f32.mrf.mxu3 }
  0xb5   : > { %v868_v28 = vadd.f32 %v1637_v11, %v803_v26  ;;  %v758_v29 = vadd.f32 %v757_v14, %v543_v27 }
  0xb6   : > { %v763_v30 = vpop.f32.mrf.mxu1 }
  0xb7   : > { %v900_v31 = vmax.f32 %v868_v28, 0.0  ;;  %v853_v32 = vadd.f32 %v1637_v11, %v758_v29 }
  0xb9   : > { %932 = vst [vmem:[%s1644_s15 + $0x88] sm:$0xff] %v900_v31  ;;  %v885_v34 = vmax.f32 %v853_v32, 0.0 }
  0xba   : > { %v591_v35 = vpop.f32.mrf.mxu2 }
  0xbb   : > { %917 = vst [vmem:[%s1644_s15 + $0x10] sm:$0xff] %v885_v34  ;;  %v806_v36 = vadd.f32 %v805_v16, %v591_v35 }
  0xbc   : > { %v546_v37 = vpop.f32.mrf.mxu0  ;;  %v814_v43 = vpop.f32.mrf.mxu3 }
  0xbd   : > { %v869_v38 = vadd.f32 %v1637_v11, %v806_v36  ;;  %v761_v39 = vadd.f32 %v760_v21, %v546_v37 }
  0xbe   : > { %v766_v40 = vpop.f32.mrf.mxu1 }
  0xbf   : > { %v901_v41 = vmax.f32 %v869_v38, 0.0  ;;  %v854_v42 = vadd.f32 %v1637_v11, %v761_v39 }
  0xc1   : > { %933 = vst [vmem:[%s1644_s15 + $0x90] sm:$0xff] %v901_v41  ;;  %v886_v44 = vmax.f32 %v854_v42, 0.0 }
  0xc2   : > { %v594_v45 = vpop.f32.mrf.mxu2 }
  0xc3   : > { %918 = vst [vmem:[%s1644_s15 + $0x18] sm:$0xff] %v886_v44  ;;  %v809_v46 = vadd.f32 %v808_v23, %v594_v45 }
  0xc4   : > { %v549_v47 = vpop.f32.mrf.mxu0  ;;  %v817_v53 = vpop.f32.mrf.mxu3 }
  0xc5   : > { %v870_v48 = vadd.f32 %v1637_v11, %v809_v46  ;;  %v764_v49 = vadd.f32 %v763_v30, %v549_v47 }
  0xc6   : > { %v769_v50 = vpop.f32.mrf.mxu1 }
  0xc7   : > { %v902_v51 = vmax.f32 %v870_v48, 0.0  ;;  %v855_v52 = vadd.f32 %v1637_v11, %v764_v49 }
  0xc9   : > { %934 = vst [vmem:[%s1644_s15 + $0x98] sm:$0xff] %v902_v51  ;;  %v887_v54 = vmax.f32 %v855_v52, 0.0 }
  0xca   : > { %v597_v55 = vpop.f32.mrf.mxu2 }
  0xcb   : > { %919 = vst [vmem:[%s1644_s15 + $0x20] sm:$0xff] %v887_v54  ;;  %v812_v56 = vadd.f32 %v811_v33, %v597_v55 }
  0xcc   : > { %v552_v57 = vpop.f32.mrf.mxu0  ;;  %v820_v63 = vpop.f32.mrf.mxu3 }
  0xcd   : > { %v871_v58 = vadd.f32 %v1637_v11, %v812_v56  ;;  %v767_v59 = vadd.f32 %v766_v40, %v552_v57 }
  0xce   : > { %v772_v60 = vpop.f32.mrf.mxu1 }
  0xcf   : > { %v903_v61 = vmax.f32 %v871_v58, 0.0  ;;  %v856_v62 = vadd.f32 %v1637_v11, %v767_v59 }
  0xd1   : > { %935 = vst [vmem:[%s1644_s15 + $0xa0] sm:$0xff] %v903_v61  ;;  %v888_v0 = vmax.f32 %v856_v62, 0.0 }
  0xd2   : > { %v600_v1 = vpop.f32.mrf.mxu2 }
  0xd3   : > { %920 = vst [vmem:[%s1644_s15 + $0x28] sm:$0xff] %v888_v0  ;;  %v815_v2 = vadd.f32 %v814_v43, %v600_v1 }
  0xd4   : > { %v555_v3 = vpop.f32.mrf.mxu0  ;;  %v823_v12 = vpop.f32.mrf.mxu3 }
  0xd5   : > { %v872_v4 = vadd.f32 %v1637_v11, %v815_v2  ;;  %v770_v5 = vadd.f32 %v769_v50, %v555_v3 }
  0xd6   : > { %v775_v6 = vpop.f32.mrf.mxu1 }
  0xd7   : > { %v904_v7 = vmax.f32 %v872_v4, 0.0  ;;  %v857_v8 = vadd.f32 %v1637_v11, %v770_v5 }
  0xd9   : > { %936 = vst [vmem:[%s1644_s15 + $0xa8] sm:$0xff] %v904_v7  ;;  %v889_v9 = vmax.f32 %v857_v8, 0.0 }
  0xda   : > { %v603_v10 = vpop.f32.mrf.mxu2 }
  0xdb   : > { %921 = vst [vmem:[%s1644_s15 + $0x30] sm:$0xff] %v889_v9  ;;  %v818_v13 = vadd.f32 %v817_v53, %v603_v10 }
  0xdc   : > { %v558_v14 = vpop.f32.mrf.mxu0  ;;  %v826_v25 = vpop.f32.mrf.mxu3 }
  0xdd   : > { %v873_v15 = vadd.f32 %v1637_v11, %v818_v13  ;;  %v773_v16 = vadd.f32 %v772_v60, %v558_v14 }
  0xde   : > { %v778_v17 = vpop.f32.mrf.mxu1 }
  0xdf   : > { %v905_v19 = vmax.f32 %v873_v15, 0.0  ;;  %v858_v20 = vadd.f32 %v1637_v11, %v773_v16 }
  0xe1   : > { %937 = vst [vmem:[%s1644_s15 + $0xb0] sm:$0xff] %v905_v19  ;;  %v890_v21 = vmax.f32 %v858_v20, 0.0 }
  0xe2   : > { %v606_v22 = vpop.f32.mrf.mxu2 }
  0xe3   : > { %922 = vst [vmem:[%s1644_s15 + $0x38] sm:$0xff] %v890_v21  ;;  %v821_v23 = vadd.f32 %v820_v63, %v606_v22 }
  0xe4   : > { %v561_v24 = vpop.f32.mrf.mxu0  ;;  %v829_v38 = vpop.f32.mrf.mxu3 }
  0xe5   : > { %v874_v26 = vadd.f32 %v1637_v11, %v821_v23  ;;  %v776_v27 = vadd.f32 %v775_v6, %v561_v24 }
  0xe6   : > { %v781_v28 = vpop.f32.mrf.mxu1 }
  0xe7   : > { %v906_v29 = vmax.f32 %v874_v26, 0.0  ;;  %v859_v30 = vadd.f32 %v1637_v11, %v776_v27 }
  0xe9   : > { %938 = vst [vmem:[%s1644_s15 + $0xb8] sm:$0xff] %v906_v29  ;;  %v891_v31 = vmax.f32 %v859_v30, 0.0 }
  0xea   : > { %v609_v32 = vpop.f32.mrf.mxu2 }
  0xeb   : > { %923 = vst [vmem:[%s1644_s15 + $0x40] sm:$0xff] %v891_v31  ;;  %v824_v33 = vadd.f32 %v823_v12, %v609_v32 }
  0xec   : > { %v564_v34 = vpop.f32.mrf.mxu0  ;;  %v832_v50 = vpop.f32.mrf.mxu3 }
  0xed   : > { %v875_v35 = vadd.f32 %v1637_v11, %v824_v33  ;;  %v779_v36 = vadd.f32 %v778_v17, %v564_v34 }
  0xee   : > { %v784_v37 = vpop.f32.mrf.mxu1 }
  0xef   : > { %v907_v39 = vmax.f32 %v875_v35, 0.0  ;;  %v860_v40 = vadd.f32 %v1637_v11, %v779_v36 }
  0xf1   : > { %939 = vst [vmem:[%s1644_s15 + $0xc0] sm:$0xff] %v907_v39  ;;  %v892_v41 = vmax.f32 %v860_v40, 0.0 }
  0xf2   : > { %v612_v42 = vpop.f32.mrf.mxu2 }
  0xf3   : > { %924 = vst [vmem:[%s1644_s15 + $0x48] sm:$0xff] %v892_v41  ;;  %v827_v43 = vadd.f32 %v826_v25, %v612_v42 }
  0xf4   : > { %v567_v44 = vpop.f32.mrf.mxu0  ;;  %v835_v62 = vpop.f32.mrf.mxu3 }
  0xf5   : > { %v876_v45 = vadd.f32 %v1637_v11, %v827_v43  ;;  %v782_v46 = vadd.f32 %v781_v28, %v567_v44 }
  0xf6   : > { %v787_v47 = vpop.f32.mrf.mxu1 }
  0xf7   : > { %v908_v48 = vmax.f32 %v876_v45, 0.0  ;;  %v861_v49 = vadd.f32 %v1637_v11, %v782_v46 }
  0xf9   : > { %940 = vst [vmem:[%s1644_s15 + $0xc8] sm:$0xff] %v908_v48  ;;  %v893_v51 = vmax.f32 %v861_v49, 0.0 }
  0xfa   : > { %v615_v52 = vpop.f32.mrf.mxu2 }
  0xfb   : > { %925 = vst [vmem:[%s1644_s15 + $0x50] sm:$0xff] %v893_v51  ;;  %v830_v53 = vadd.f32 %v829_v38, %v615_v52 }
  0xfc   : > { %v570_v54 = vpop.f32.mrf.mxu0  ;;  %v838_v10 = vpop.f32.mrf.mxu3 }
  0xfd   : > { %v877_v55 = vadd.f32 %v1637_v11, %v830_v53  ;;  %v785_v56 = vadd.f32 %v784_v37, %v570_v54 }
  0xfe   : > { %v790_v57 = vpop.f32.mrf.mxu1 }
  0xff   : > { %v909_v58 = vmax.f32 %v877_v55, 0.0  ;;  %v862_v59 = vadd.f32 %v1637_v11, %v785_v56 }
 0x101   : > { %941 = vst [vmem:[%s1644_s15 + $0xd0] sm:$0xff] %v909_v58  ;;  %v894_v60 = vmax.f32 %v862_v59, 0.0 }
 0x102   : > { %v618_v61 = vpop.f32.mrf.mxu2 }
 0x103   : > { %926 = vst [vmem:[%s1644_s15 + $0x58] sm:$0xff] %v894_v60  ;;  %v833_v63 = vadd.f32 %v832_v50, %v618_v61 }
 0x104   : > { %v573_v0 = vpop.f32.mrf.mxu0  ;;  %v841_v25 = vpop.f32.mrf.mxu3 }
 0x105   : > { %v878_v1 = vadd.f32 %v1637_v11, %v833_v63  ;;  %v788_v2 = vadd.f32 %v787_v47, %v573_v0 }
 0x106   : > { %v793_v3 = vpop.f32.mrf.mxu1 }
 0x107   : > { %v910_v4 = vmax.f32 %v878_v1, 0.0  ;;  %v863_v5 = vadd.f32 %v1637_v11, %v788_v2 }
 0x109   : > { %942 = vst [vmem:[%s1644_s15 + $0xd8] sm:$0xff] %v910_v4  ;;  %v895_v6 = vmax.f32 %v863_v5, 0.0 }
 0x10a   : > { %v621_v7 = vpop.f32.mrf.mxu2 }
 0x10b   : > { %927 = vst [vmem:[%s1644_s15 + $0x60] sm:$0xff] %v895_v6  ;;  %v836_v8 = vadd.f32 %v835_v62, %v621_v7 }
 0x10c   : > { %v576_v9 = vpop.f32.mrf.mxu0  ;;  %v844_v38 = vpop.f32.mrf.mxu3 }
 0x10d   : > { %v879_v12 = vadd.f32 %v1637_v11, %v836_v8  ;;  %v791_v13 = vadd.f32 %v790_v57, %v576_v9 }
 0x10e   : > { %v796_v14 = vpop.f32.mrf.mxu1 }
 0x10f   : > { %v911_v15 = vmax.f32 %v879_v12, 0.0  ;;  %v864_v16 = vadd.f32 %v1637_v11, %v791_v13 }
 0x111   : > { %943 = vst [vmem:[%s1644_s15 + $0xe0] sm:$0xff] %v911_v15  ;;  %v896_v17 = vmax.f32 %v864_v16, 0.0 }
 0x112   : > { %v624_v19 = vpop.f32.mrf.mxu2 }
 0x113   : > { %928 = vst [vmem:[%s1644_s15 + $0x68] sm:$0xff] %v896_v17  ;;  %v839_v20 = vadd.f32 %v838_v10, %v624_v19 }
 0x114   : > { %v579_v21 = vpop.f32.mrf.mxu0 }
 0x115   : > { %v880_v22 = vadd.f32 %v1637_v11, %v839_v20  ;;  %v794_v23 = vadd.f32 %v793_v3, %v579_v21 }
 0x116   : > { %v799_v24 = vpop.f32.mrf.mxu1 }
 0x117   : > { %v912_v26 = vmax.f32 %v880_v22, 0.0  ;;  %v865_v27 = vadd.f32 %v1637_v11, %v794_v23  ;;  %v800_v28 = vadd.f32 %v799_v24, %v1642_v18 }
 0x119   : > { %944 = vst [vmem:[%s1644_s15 + $0xe8] sm:$0xff] %v912_v26  ;;  %v897_v29 = vmax.f32 %v865_v27, 0.0  ;;  %v867_v30 = vadd.f32 %v1637_v11, %v800_v28 }
 0x11a   : > { %v627_v31 = vpop.f32.mrf.mxu2 }
 0x11b   : > { %929 = vst [vmem:[%s1644_s15 + $0x70] sm:$0xff] %v897_v29  ;;  %v899_v32 = vmax.f32 %v867_v30, 0.0  ;;  %v842_v33 = vadd.f32 %v841_v25, %v627_v31 }
 0x11c   : > { %v582_v34 = vpop.f32.mrf.mxu0 }
 0x11d   : > { %931 = vst [vmem:[%s1644_s15 + $0x80] sm:$0xff] %v899_v32  ;;  %v881_v35 = vadd.f32 %v1637_v11, %v842_v33  ;;  %v797_v36 = vadd.f32 %v796_v14, %v582_v34 }
 0x11f   : > { %v913_v37 = vmax.f32 %v881_v35, 0.0  ;;  %v866_v18 = vadd.f32 %v1637_v11, %v797_v36 }
 0x121   : > { %945 = vst [vmem:[%s1644_s15 + $0xf0] sm:$0xff] %v913_v37  ;;  %v898_v39 = vmax.f32 %v866_v18, 0.0 }
 0x122   : > { %v630_v40 = vpop.f32.mrf.mxu2 }
 0x123   : > { %930 = vst [vmem:[%s1644_s15 + $0x78] sm:$0xff] %v898_v39  ;;  %v845_v41 = vadd.f32 %v844_v38, %v630_v40 }
 0x125   : > { %v882_v42 = vadd.f32 %v1637_v11, %v845_v41 }
 0x127   : > { %v914_v43 = vmax.f32 %v882_v42, 0.0 }
 0x129   : > { %946 = vst [vmem:[%s1644_s15 + $0xf8] sm:$0xff] %v914_v43 }
 0x12a   : > { %1288 = shalt.err (!%p1285_p5)
}
 0x12b   : > { %s1341_s14 = smov 128   ;;  %s1342_s15 = smov 8  }
 0x12c   : > { %1203 = dma.vmem_to_hbm [thread:$0]  (%p1413_p4), %s964_s27, 4096, %s966_s29, %s948_s21, %s1341_s14, %s1341_s14, %s1342_s15  }
 0x12d PF: > { %p1209_p6 = scmp.ge.s32.totalorder %s1339_s23, 2  ;;  %s980_s16 = sand.u32 1, %s1319_s18  }
 0x12e   : > { %s981_s17 = scalar_lea.sflag [#allocation3], %s980_s16 }
 0x12f   : > { %p1206_p7 = pnand %p1209_p6, %p1420_p8 }
 0x131   : > { %p1207_p9 = pneg %p1206_p7 }
 0x133   : > { %1314 = dma.done.wait (%p1207_p9), %s981_s17, 4096  }
 0x134   : > { %1316 = vsyncadd (%p1207_p9), %s981_s17, 4294963200  ;;  %s18_s23 = sadd.s32 1, %s1339_s23   ;;  %s1757_s18 = smov %s1323_s19 }
 0x135   : > { %p15_p10 = scmp.ge.s32.totalorder %s18_s23, 4   ;;  %s1758_s19 = smov %s1327_s20 }
 0x136   : > { %s1759_s20 = smov %s1426_s6  ;;  %s1760_s21 = smov %s1335_s22 }
 0x137   : > { %s1761_s22 = smov %s1763_s26  ;;  %17 = sbr.rel (!%p15_p10) target bundleno = 4 (0x4), region = 87 }
 0x13c   :  { %987 = vsyncpa [#allocation3], 1 }
 0x13d   :  { %989 = vsyncpa [#allocation3 + $0x1], 1 }

</bundles_post_ra>
